<compile_context>
chip_gen: v6e
topology: v6e:2x2x1
jax: 0.10.0
libtpu: 0.0.40
codegen_flags: <defaults>
</compile_context>

<pallas_src>
import math
import functools

import jax
import jax.numpy as jnp
from jax import lax
from jax.experimental import pallas as pl
from jax.experimental.pallas import tpu as pltpu


def _layernorm(x, gamma, beta, eps=1e-5):
    mu = jnp.mean(x, axis=-1, keepdims=True)
    var = jnp.mean((x - mu) ** 2, axis=-1, keepdims=True)
    return (x - mu) * lax.rsqrt(var + eps) * gamma + beta


# ---------------- kernel A: fused QKV projection over flattened (B*S, E) rows ----------
def _qkv_proj_kernel(HE, x_ref, w_ref, b_ref, q_ref, k_ref, v_ref):
    xw = jnp.dot(x_ref[...].astype(jnp.bfloat16), w_ref[...],
                 preferred_element_type=jnp.float32) + b_ref[...]
    # three lane-dense (block_m, HE) stores; HE is a multiple of 128 in this config
    q_ref[...] = xw[:, :HE].astype(q_ref.dtype)
    k_ref[...] = xw[:, HE:2 * HE].astype(k_ref.dtype)
    v_ref[...] = xw[:, 2 * HE:3 * HE].astype(v_ref.dtype)


# ---------------- kernel B: masked attention, all heads of one batch element -----------
def _attention_kernel(scale, q_ref, k_ref, v_ref, o_ref):
    q = q_ref[0]                                             # (H, S, E) bf16
    k = k_ref[0]
    v = v_ref[0]
    s = jnp.einsum("hqe,hke->hqk", q, k,
                   preferred_element_type=jnp.float32) * scale
    row = lax.broadcasted_iota(jnp.int32, s.shape, 1)
    col = lax.broadcasted_iota(jnp.int32, s.shape, 2)
    s = jnp.where(col > row, -jnp.inf, s)                    # causal (triu, diag=1) mask
    m = jnp.max(s, axis=-1, keepdims=True)
    p = jnp.exp(s - m)
    a = p * pl.reciprocal(jnp.sum(p, axis=-1, keepdims=True), approx=True)
    o_ref[0] = jnp.einsum("hqk,hke->hqe", a.astype(jnp.bfloat16), v,
                          preferred_element_type=jnp.float32).astype(o_ref.dtype)


# ---------------- kernel C: out-proj + residual + LN1 + FFN + residual + LN2 -----------
def _tail_kernel(slab_ref, x_ref, wo_ref, bo_ref, g1_ref, be1_ref,
                 w1_ref, b1_ref, w2_ref, b2_ref, g2_ref, be2_ref, o_ref):
    x = x_ref[...]                                           # (bm, E) f32
    attn_out = jnp.dot(slab_ref[...], wo_ref[...],
                       preferred_element_type=jnp.float32) + bo_ref[...]
    # TODO(synk): nn.Dropout is implemented as identity (inference behavior).
    x1 = _layernorm(attn_out + x, g1_ref[...], be1_ref[...])
    hid = jnp.maximum(
        jnp.dot(x1.astype(jnp.bfloat16), w1_ref[...],
                preferred_element_type=jnp.float32) + b1_ref[...], 0.0)
    ff = jnp.dot(hid.astype(jnp.bfloat16), w2_ref[...],
                 preferred_element_type=jnp.float32) + b2_ref[...]
    o_ref[...] = _layernorm(ff + x1, g2_ref[...], be2_ref[...]).astype(o_ref.dtype)


# ---------------- parameter prep: done ONCE, outside the per-step forward --------------
def prepare_params(params):
    bf = jnp.bfloat16
    return dict(
        w_attn_t=params["w_attn"].T.astype(bf),      # (E, 3*H*E)
        b_attn=params["b_attn"][None, :],            # (1, 3*H*E) f32
        w_out_t=params["w_out"].T.astype(bf),        # (H*E, E)
        b_out=params["b_out"][None, :],
        g1=params["g1"][None, :], be1=params["be1"][None, :],
        w1_t=params["w1"].T.astype(bf),              # (E, F)
        b1=params["b1"][None, :],
        w2_t=params["w2"].T.astype(bf),              # (F, E)
        b2=params["b2"][None, :],
        g2=params["g2"][None, :], be2=params["be2"][None, :],
    )


def _pick_row_block(total):
    for bm in (512, 256, 128, 64, 32, 16, 8):
        if total % bm == 0:
            return bm
    return total


def gpt_block_forward(x, p, num_heads):
    B, S, E = x.shape
    H = num_heads
    HE = H * E
    F = p["w1_t"].shape[1]
    BS = B * S
    scale = 1.0 / math.sqrt(E)

    cparams = pltpu.CompilerParams(dimension_semantics=("parallel",))

    # ---- A) QKV projection over flattened rows ----
    x_flat = x.reshape(BS, E)
    bm = _pick_row_block(BS)
    q_flat, k_flat, v_flat = pl.pallas_call(
        functools.partial(_qkv_proj_kernel, HE),
        out_shape=(jax.ShapeDtypeStruct((BS, HE), jnp.bfloat16),
                   jax.ShapeDtypeStruct((BS, HE), jnp.bfloat16),
                   jax.ShapeDtypeStruct((BS, HE), jnp.bfloat16)),
        grid=(BS // bm,),
        in_specs=[pl.BlockSpec((bm, E), lambda i: (i, 0)),
                  pl.BlockSpec((E, 3 * HE), lambda i: (0, 0)),
                  pl.BlockSpec((1, 3 * HE), lambda i: (0, 0))],
        out_specs=[pl.BlockSpec((bm, HE), lambda i: (i, 0))] * 3,
        compiler_params=cparams,
    )(x_flat, p["w_attn_t"], p["b_attn"])

    # torch-style flat .view((-1, H, S, E)): free reshape of contiguous HBM buffers
    q = q_flat.reshape(B, H, S, E)
    k = k_flat.reshape(B, H, S, E)
    v = v_flat.reshape(B, H, S, E)

    # ---- B) masked attention, one grid step per batch element ----
    qkv_spec = pl.BlockSpec((1, H, S, E), lambda b: (b, 0, 0, 0))
    head_out = pl.pallas_call(
        functools.partial(_attention_kernel, scale),
        out_shape=jax.ShapeDtypeStruct((B, H, S, E), jnp.bfloat16),
        grid=(B,),
        in_specs=[qkv_spec, qkv_spec, qkv_spec],
        out_specs=qkv_spec,
        compiler_params=cparams,
    )(q, k, v)

    # torch-style flat .view((-1, S, H*E)): free reshape again
    slab = head_out.reshape(BS, HE)

    # ---- C) output proj + residuals + layernorms + FFN over flattened rows ----
    mat = lambda shape: pl.BlockSpec(shape, lambda i: (0, 0))
    out_flat = pl.pallas_call(
        _tail_kernel,
        out_shape=jax.ShapeDtypeStruct((BS, E), x.dtype),
        grid=(BS // bm,),
        in_specs=[pl.BlockSpec((bm, HE), lambda i: (i, 0)),
                  pl.BlockSpec((bm, E), lambda i: (i, 0)),
                  mat((HE, E)), mat((1, E)),
                  mat((1, E)), mat((1, E)),
                  mat((E, F)), mat((1, F)),
                  mat((F, E)), mat((1, E)),
                  mat((1, E)), mat((1, E))],
        out_specs=pl.BlockSpec((bm, E), lambda i: (i, 0)),
        compiler_params=cparams,
    )(slab, x_flat,
      p["w_out_t"], p["b_out"], p["g1"], p["be1"],
      p["w1_t"], p["b1"], p["w2_t"], p["b2"], p["g2"], p["be2"])
    return out_flat.reshape(B, S, E)


# ---------------- pure-JAX f32 reference (mirrors the torch forward exactly) ------------
def gpt_block_reference(x, params, num_heads):
    B, S, E = x.shape
    H = num_heads
    HE = H * E
    proj = x @ params["w_attn"].T + params["b_attn"]
    q, k, v = jnp.split(proj, 3, axis=-1)
    q = q.reshape(B, H, S, E)           # same flat .view() as the torch code
    k = k.reshape(B, H, S, E)
    v = v.reshape(B, H, S, E)
    scores = jnp.einsum("bhse,bhte->bhst", q, k) / math.sqrt(E)
    mask = jnp.triu(jnp.full((S, S), -jnp.inf, jnp.float32), 1)
    attn = jax.nn.softmax(scores + mask, axis=-1)
    head_out = jnp.einsum("bhst,bhte->bhse", attn, v).reshape(B, S, HE)
    attn_out = head_out @ params["w_out"].T + params["b_out"]

    def ln(z, g, b):
        mu = z.mean(-1, keepdims=True)
        var = ((z - mu) ** 2).mean(-1, keepdims=True)
        return (z - mu) / jnp.sqrt(var + 1e-5) * g + b

    x1 = ln(attn_out + x, params["g1"], params["be1"])
    ff = jax.nn.relu(x1 @ params["w1"].T + params["b1"]) @ params["w2"].T + params["b2"]
    return ln(ff + x1, params["g2"], params["be2"])


if __name__ == "__main__":
    B, S, E, H, F = 2, 8, 32, 4, 64     # batch, seq, embedding_dim, num_heads, ff_dim

    key = jax.random.PRNGKey(0)
    kx, kwa, kba, kwo, kbo, kw1, kb1, kw2, kb2 = jax.random.split(key, 9)

    params = dict(
        w_attn=0.05 * jax.random.normal(kwa, (3 * H * E, E), jnp.float32),
        b_attn=0.05 * jax.random.normal(kba, (3 * H * E,), jnp.float32),
        w_out=0.05 * jax.random.normal(kwo, (E, H * E), jnp.float32),
        b_out=0.05 * jax.random.normal(kbo, (E,), jnp.float32),
        g1=jnp.ones((E,), jnp.float32),
        be1=jnp.zeros((E,), jnp.float32),
        w1=0.05 * jax.random.normal(kw1, (F, E), jnp.float32),
        b1=0.05 * jax.random.normal(kb1, (F,), jnp.float32),
        w2=0.05 * jax.random.normal(kw2, (E, F), jnp.float32),
        b2=0.05 * jax.random.normal(kb2, (E,), jnp.float32),
        g2=jnp.ones((E,), jnp.float32),
        be2=jnp.zeros((E,), jnp.float32),
    )
    x = jax.random.normal(kx, (B, S, E), jnp.float32)

    prepped = prepare_params(params)                 # one-time weight transpose / bf16 cast
    fwd = jax.jit(functools.partial(gpt_block_forward, num_heads=H))

    out = fwd(x, prepped)
    jax.block_until_ready(out)

    ref = gpt_block_reference(x, params, H)
    assert out.shape == (B, S, E)
    # bf16 MXU operands + approx reciprocal => slightly looser tolerance than pure f32
    assert jnp.allclose(out, ref, atol=2e-2, rtol=2e-2), "mismatch vs reference"

    print("KERNEL_OK")
</pallas_src>

<mosaic_0001>
module attributes {stable_mosaic.version = 11 : i64} {
  func.func @_qkv_proj_kernel(%arg0: i32, %arg1: memref<16x32xf32, #tpu.memory_space<vmem>>, %arg2: memref<32x384xbf16, #tpu.memory_space<vmem>>, %arg3: memref<1x384xf32, #tpu.memory_space<vmem>>, %arg4: memref<16x128xbf16, #tpu.memory_space<vmem>>, %arg5: memref<16x128xbf16, #tpu.memory_space<vmem>>, %arg6: memref<16x128xbf16, #tpu.memory_space<vmem>>) attributes {dimension_semantics = [#tpu.dimension_semantics<parallel>], iteration_bounds = array<i64: 1>, scalar_prefetch = 0 : i64, scratch_operands = 0 : i64, tpu.core_type = #tpu.core_type<tc>, window_params = [{transform_indices = @transform_0, window_bounds = array<i64: 16, 32>}, {pipeline_mode = #tpu.pipeline_mode<synchronous>, transform_indices = @transform_1, window_bounds = array<i64: 32, 384>}, {pipeline_mode = #tpu.pipeline_mode<synchronous>, transform_indices = @transform_2, window_bounds = array<i64: 1, 384>}, {transform_indices = @transform_3, window_bounds = array<i64: 16, 128>}, {transform_indices = @transform_4, window_bounds = array<i64: 16, 128>}, {transform_indices = @transform_5, window_bounds = array<i64: 16, 128>}]} {
    %c0 = arith.constant 0 : index
    %c0_0 = arith.constant 0 : index
    %0 = vector.load %arg1[%c0, %c0_0] : memref<16x32xf32, #tpu.memory_space<vmem>>, vector<16x32xf32>
    %1 = arith.truncf %0 : vector<16x32xf32> to vector<16x32xbf16>
    %c0_1 = arith.constant 0 : index
    %c0_2 = arith.constant 0 : index
    %2 = vector.load %arg2[%c0_1, %c0_2] : memref<32x384xbf16, #tpu.memory_space<vmem>>, vector<32x384xbf16>
    %cst = arith.constant dense<0.000000e+00> : vector<16x384xf32>
    %3 = tpu.matmul %1, %2, %cst {dimension_numbers = #tpu.dot_dimension_numbers<[1], [0], [0], [1], [0, 0, 1, 1], [], []>} : vector<16x32xbf16>, vector<32x384xbf16>, vector<16x384xf32> -> vector<16x384xf32>
    %c0_3 = arith.constant 0 : index
    %c0_4 = arith.constant 0 : index
    %4 = vector.load %arg3[%c0_3, %c0_4] : memref<1x384xf32, #tpu.memory_space<vmem>>, vector<1x384xf32>
    %5 = vector.broadcast %4 : vector<1x384xf32> to vector<16x384xf32>
    %6 = arith.addf %3, %5 : vector<16x384xf32>
    %7 = vector.extract_strided_slice %6 {offsets = [0, 0], sizes = [16, 128], strides = [1, 1]} : vector<16x384xf32> to vector<16x128xf32>
    %8 = arith.truncf %7 : vector<16x128xf32> to vector<16x128xbf16>
    %c0_5 = arith.constant 0 : index
    %c0_6 = arith.constant 0 : index
    %9 = vector.load %arg4[%c0_5, %c0_6] : memref<16x128xbf16, #tpu.memory_space<vmem>>, vector<16x128xbf16>
    tpu.vector_store %arg4[%c0_5, %c0_6], %8 {strides = array<i32>} : memref<16x128xbf16, #tpu.memory_space<vmem>>, vector<16x128xbf16>,
    %10 = vector.extract_strided_slice %6 {offsets = [0, 128], sizes = [16, 128], strides = [1, 1]} : vector<16x384xf32> to vector<16x128xf32>
    %11 = arith.truncf %10 : vector<16x128xf32> to vector<16x128xbf16>
    %c0_7 = arith.constant 0 : index
    %c0_8 = arith.constant 0 : index
    %12 = vector.load %arg5[%c0_7, %c0_8] : memref<16x128xbf16, #tpu.memory_space<vmem>>, vector<16x128xbf16>
    tpu.vector_store %arg5[%c0_7, %c0_8], %11 {strides = array<i32>} : memref<16x128xbf16, #tpu.memory_space<vmem>>, vector<16x128xbf16>,
    %13 = vector.extract_strided_slice %6 {offsets = [0, 256], sizes = [16, 128], strides = [1, 1]} : vector<16x384xf32> to vector<16x128xf32>
    %14 = arith.truncf %13 : vector<16x128xf32> to vector<16x128xbf16>
    %c0_9 = arith.constant 0 : index
    %c0_10 = arith.constant 0 : index
    %15 = vector.load %arg6[%c0_9, %c0_10] : memref<16x128xbf16, #tpu.memory_space<vmem>>, vector<16x128xbf16>
    tpu.vector_store %arg6[%c0_9, %c0_10], %14 {strides = array<i32>} : memref<16x128xbf16, #tpu.memory_space<vmem>>, vector<16x128xbf16>,
    return
  }
  func.func @transform_0(%arg0: i32) -> (i32, i32) {
    %c0_i32 = arith.constant 0 : i32
    %c0_i32_0 = arith.constant 0 : i32
    return %arg0, %c0_i32 : i32, i32
  }
  func.func @transform_1(%arg0: i32) -> (i32, i32) {
    %c0_i32 = arith.constant 0 : i32
    %c0_i32_0 = arith.constant 0 : i32
    %c0_i32_1 = arith.constant 0 : i32
    return %c0_i32, %c0_i32_0 : i32, i32
  }
  func.func @transform_2(%arg0: i32) -> (i32, i32) {
    %c0_i32 = arith.constant 0 : i32
    %c0_i32_0 = arith.constant 0 : i32
    %c0_i32_1 = arith.constant 0 : i32
    return %c0_i32, %c0_i32_0 : i32, i32
  }
  func.func @transform_3(%arg0: i32) -> (i32, i32) {
    %c0_i32 = arith.constant 0 : i32
    %c0_i32_0 = arith.constant 0 : i32
    return %arg0, %c0_i32 : i32, i32
  }
  func.func @transform_4(%arg0: i32) -> (i32, i32) {
    %c0_i32 = arith.constant 0 : i32
    %c0_i32_0 = arith.constant 0 : i32
    return %arg0, %c0_i32 : i32, i32
  }
  func.func @transform_5(%arg0: i32) -> (i32, i32) {
    %c0_i32 = arith.constant 0 : i32
    %c0_i32_0 = arith.constant 0 : i32
    return %arg0, %c0_i32 : i32, i32
  }
}

module attributes {stable_mosaic.version = 11 : i64} {
  func.func @_attention_kernel(%arg0: i32, %arg1: memref<1x4x8x32xbf16, #tpu.memory_space<vmem>>, %arg2: memref<1x4x8x32xbf16, #tpu.memory_space<vmem>>, %arg3: memref<1x4x8x32xbf16, #tpu.memory_space<vmem>>, %arg4: memref<1x4x8x32xbf16, #tpu.memory_space<vmem>>) attributes {dimension_semantics = [#tpu.dimension_semantics<parallel>], iteration_bounds = array<i64: 2>, scalar_prefetch = 0 : i64, scratch_operands = 0 : i64, tpu.core_type = #tpu.core_type<tc>, window_params = [{transform_indices = @transform_0, window_bounds = array<i64: 1, 4, 8, 32>}, {transform_indices = @transform_1, window_bounds = array<i64: 1, 4, 8, 32>}, {transform_indices = @transform_2, window_bounds = array<i64: 1, 4, 8, 32>}, {transform_indices = @transform_3, window_bounds = array<i64: 1, 4, 8, 32>}]} {
    %c0 = arith.constant 0 : index
    %c0_0 = arith.constant 0 : index
    %c0_1 = arith.constant 0 : index
    %c0_2 = arith.constant 0 : index
    %0 = vector.load %arg1[%c0, %c0_0, %c0_1, %c0_2] : memref<1x4x8x32xbf16, #tpu.memory_space<vmem>>, vector<1x4x8x32xbf16>
    %1 = vector.shape_cast %0 : vector<1x4x8x32xbf16> to vector<4x8x32xbf16>
    %c0_3 = arith.constant 0 : index
    %c0_4 = arith.constant 0 : index
    %c0_5 = arith.constant 0 : index
    %c0_6 = arith.constant 0 : index
    %2 = vector.load %arg2[%c0_3, %c0_4, %c0_5, %c0_6] : memref<1x4x8x32xbf16, #tpu.memory_space<vmem>>, vector<1x4x8x32xbf16>
    %3 = vector.shape_cast %2 : vector<1x4x8x32xbf16> to vector<4x8x32xbf16>
    %c0_7 = arith.constant 0 : index
    %c0_8 = arith.constant 0 : index
    %c0_9 = arith.constant 0 : index
    %c0_10 = arith.constant 0 : index
    %4 = vector.load %arg3[%c0_7, %c0_8, %c0_9, %c0_10] : memref<1x4x8x32xbf16, #tpu.memory_space<vmem>>, vector<1x4x8x32xbf16>
    %5 = vector.shape_cast %4 : vector<1x4x8x32xbf16> to vector<4x8x32xbf16>
    "tpu.trace_start"() <{level = 10 : i32, message = "hqe,hke->hqk"}> : () -> ()
    %cst = arith.constant dense<0.000000e+00> : vector<4x8x8xf32>
    %6 = tpu.matmul %1, %3, %cst {dimension_numbers = #tpu.dot_dimension_numbers<[2], [2], [1], [1], [0, 0, 0, 1, 1, 1], [0], [0]>} : vector<4x8x32xbf16>, vector<4x8x32xbf16>, vector<4x8x8xf32> -> vector<4x8x8xf32>
    "tpu.trace_stop"() : () -> ()
    %cst_11 = arith.constant 0.176776692 : f32
    %7 = vector.broadcast %cst_11 : f32 to vector<4x8x8xf32>
    %8 = arith.mulf %6, %7 : vector<4x8x8xf32>
    %9 = tpu.iota {dimensions = array<i32: 1>} : vector<4x8x8xi32>
    %10 = tpu.iota {dimensions = array<i32: 2>} : vector<4x8x8xi32>
    %11 = arith.cmpi sgt, %10, %9 : vector<4x8x8xi32>
    %cst_12 = arith.constant 0xFF800000 : f32
    %12 = vector.broadcast %cst_12 : f32 to vector<4x8x8xf32>
    %13 = arith.select %11, %12, %8 : vector<4x8x8xi1>, vector<4x8x8xf32>
    %cst_13 = arith.constant dense<0xFF800000> : vector<4x8xf32>
    %14 = vector.multi_reduction <maximumf>, %13, %cst_13 [2] : vector<4x8x8xf32> to vector<4x8xf32>
    %15 = vector.shape_cast %14 : vector<4x8xf32> to vector<4x8x1xf32>
    %16 = vector.broadcast %15 : vector<4x8x1xf32> to vector<4x8x8xf32>
    %17 = arith.subf %13, %16 : vector<4x8x8xf32>
    %18 = math.exp %17 : vector<4x8x8xf32>
    %cst_14 = arith.constant dense<0.000000e+00> : vector<4x8xf32>
    %19 = vector.multi_reduction <add>, %18, %cst_14 [2] : vector<4x8x8xf32> to vector<4x8xf32>
    %20 = vector.shape_cast %19 : vector<4x8xf32> to vector<4x8x1xf32>
    %21 = tpu.reciprocal %20 {approx = true} : vector<4x8x1xf32> -> vector<4x8x1xf32>
    %22 = vector.broadcast %21 : vector<4x8x1xf32> to vector<4x8x8xf32>
    %23 = arith.mulf %18, %22 : vector<4x8x8xf32>
    %24 = arith.truncf %23 : vector<4x8x8xf32> to vector<4x8x8xbf16>
    "tpu.trace_start"() <{level = 10 : i32, message = "hqk,hke->hqe"}> : () -> ()
    %cst_15 = arith.constant dense<0.000000e+00> : vector<4x8x32xf32>
    %25 = tpu.matmul %24, %5, %cst_15 {dimension_numbers = #tpu.dot_dimension_numbers<[2], [1], [1], [2], [0, 0, 0, 1, 1, 2], [0], [0]>} : vector<4x8x8xbf16>, vector<4x8x32xbf16>, vector<4x8x32xf32> -> vector<4x8x32xf32>
    "tpu.trace_stop"() : () -> ()
    %26 = arith.truncf %25 : vector<4x8x32xf32> to vector<4x8x32xbf16>
    %c0_16 = arith.constant 0 : index
    %c0_17 = arith.constant 0 : index
    %c0_18 = arith.constant 0 : index
    %c0_19 = arith.constant 0 : index
    %27 = vector.load %arg4[%c0_16, %c0_17, %c0_18, %c0_19] : memref<1x4x8x32xbf16, #tpu.memory_space<vmem>>, vector<1x4x8x32xbf16>
    %28 = vector.shape_cast %27 : vector<1x4x8x32xbf16> to vector<4x8x32xbf16>
    %29 = vector.shape_cast %26 : vector<4x8x32xbf16> to vector<1x4x8x32xbf16>
    tpu.vector_store %arg4[%c0_16, %c0_17, %c0_18, %c0_19], %29 {strides = array<i32>} : memref<1x4x8x32xbf16, #tpu.memory_space<vmem>>, vector<1x4x8x32xbf16>,
    return
  }
  func.func @transform_0(%arg0: i32) -> (i32, i32, i32, i32) {
    %c0_i32 = arith.constant 0 : i32
    %c0_i32_0 = arith.constant 0 : i32
    %c0_i32_1 = arith.constant 0 : i32
    %c0_i32_2 = arith.constant 0 : i32
    return %arg0, %c0_i32, %c0_i32_0, %c0_i32_1 : i32, i32, i32, i32
  }
  func.func @transform_1(%arg0: i32) -> (i32, i32, i32, i32) {
    %c0_i32 = arith.constant 0 : i32
    %c0_i32_0 = arith.constant 0 : i32
    %c0_i32_1 = arith.constant 0 : i32
    %c0_i32_2 = arith.constant 0 : i32
    return %arg0, %c0_i32, %c0_i32_0, %c0_i32_1 : i32, i32, i32, i32
  }
  func.func @transform_2(%arg0: i32) -> (i32, i32, i32, i32) {
    %c0_i32 = arith.constant 0 : i32
    %c0_i32_0 = arith.constant 0 : i32
    %c0_i32_1 = arith.constant 0 : i32
    %c0_i32_2 = arith.constant 0 : i32
    return %arg0, %c0_i32, %c0_i32_0, %c0_i32_1 : i32, i32, i32, i32
  }
  func.func @transform_3(%arg0: i32) -> (i32, i32, i32, i32) {
    %c0_i32 = arith.constant 0 : i32
    %c0_i32_0 = arith.constant 0 : i32
    %c0_i32_1 = arith.constant 0 : i32
    %c0_i32_2 = arith.constant 0 : i32
    return %arg0, %c0_i32, %c0_i32_0, %c0_i32_1 : i32, i32, i32, i32
  }
}

module attributes {stable_mosaic.version = 11 : i64} {
  func.func @_tail_kernel(%arg0: i32, %arg1: memref<16x128xbf16, #tpu.memory_space<vmem>>, %arg2: memref<16x32xf32, #tpu.memory_space<vmem>>, %arg3: memref<128x32xbf16, #tpu.memory_space<vmem>>, %arg4: memref<1x32xf32, #tpu.memory_space<vmem>>, %arg5: memref<1x32xf32, #tpu.memory_space<vmem>>, %arg6: memref<1x32xf32, #tpu.memory_space<vmem>>, %arg7: memref<32x64xbf16, #tpu.memory_space<vmem>>, %arg8: memref<1x64xf32, #tpu.memory_space<vmem>>, %arg9: memref<64x32xbf16, #tpu.memory_space<vmem>>, %arg10: memref<1x32xf32, #tpu.memory_space<vmem>>, %arg11: memref<1x32xf32, #tpu.memory_space<vmem>>, %arg12: memref<1x32xf32, #tpu.memory_space<vmem>>, %arg13: memref<16x32xf32, #tpu.memory_space<vmem>>) attributes {dimension_semantics = [#tpu.dimension_semantics<parallel>], iteration_bounds = array<i64: 1>, scalar_prefetch = 0 : i64, scratch_operands = 0 : i64, tpu.core_type = #tpu.core_type<tc>, window_params = [{transform_indices = @transform_0, window_bounds = array<i64: 16, 128>}, {transform_indices = @transform_1, window_bounds = array<i64: 16, 32>}, {pipeline_mode = #tpu.pipeline_mode<synchronous>, transform_indices = @transform_2, window_bounds = array<i64: 128, 32>}, {pipeline_mode = #tpu.pipeline_mode<synchronous>, transform_indices = @transform_3, window_bounds = array<i64: 1, 32>}, {pipeline_mode = #tpu.pipeline_mode<synchronous>, transform_indices = @transform_4, window_bounds = array<i64: 1, 32>}, {pipeline_mode = #tpu.pipeline_mode<synchronous>, transform_indices = @transform_5, window_bounds = array<i64: 1, 32>}, {pipeline_mode = #tpu.pipeline_mode<synchronous>, transform_indices = @transform_6, window_bounds = array<i64: 32, 64>}, {pipeline_mode = #tpu.pipeline_mode<synchronous>, transform_indices = @transform_7, window_bounds = array<i64: 1, 64>}, {pipeline_mode = #tpu.pipeline_mode<synchronous>, transform_indices = @transform_8, window_bounds = array<i64: 64, 32>}, {pipeline_mode = #tpu.pipeline_mode<synchronous>, transform_indices = @transform_9, window_bounds = array<i64: 1, 32>}, {pipeline_mode = #tpu.pipeline_mode<synchronous>, transform_indices = @transform_10, window_bounds = array<i64: 1, 32>}, {pipeline_mode = #tpu.pipeline_mode<synchronous>, transform_indices = @transform_11, window_bounds = array<i64: 1, 32>}, {transform_indices = @transform_12, window_bounds = array<i64: 16, 32>}]} {
    %c0 = arith.constant 0 : index
    %c0_0 = arith.constant 0 : index
    %0 = vector.load %arg2[%c0, %c0_0] : memref<16x32xf32, #tpu.memory_space<vmem>>, vector<16x32xf32>
    %c0_1 = arith.constant 0 : index
    %c0_2 = arith.constant 0 : index
    %1 = vector.load %arg1[%c0_1, %c0_2] : memref<16x128xbf16, #tpu.memory_space<vmem>>, vector<16x128xbf16>
    %c0_3 = arith.constant 0 : index
    %c0_4 = arith.constant 0 : index
    %2 = vector.load %arg3[%c0_3, %c0_4] : memref<128x32xbf16, #tpu.memory_space<vmem>>, vector<128x32xbf16>
    %cst = arith.constant dense<0.000000e+00> : vector<16x32xf32>
    %3 = tpu.matmul %1, %2, %cst {dimension_numbers = #tpu.dot_dimension_numbers<[1], [0], [0], [1], [0, 0, 1, 1], [], []>} : vector<16x128xbf16>, vector<128x32xbf16>, vector<16x32xf32> -> vector<16x32xf32>
    %c0_5 = arith.constant 0 : index
    %c0_6 = arith.constant 0 : index
    %4 = vector.load %arg4[%c0_5, %c0_6] : memref<1x32xf32, #tpu.memory_space<vmem>>, vector<1x32xf32>
    %5 = vector.broadcast %4 : vector<1x32xf32> to vector<16x32xf32>
    %6 = arith.addf %3, %5 : vector<16x32xf32>
    %7 = arith.addf %6, %0 : vector<16x32xf32>
    %c0_7 = arith.constant 0 : index
    %c0_8 = arith.constant 0 : index
    %8 = vector.load %arg5[%c0_7, %c0_8] : memref<1x32xf32, #tpu.memory_space<vmem>>, vector<1x32xf32>
    %c0_9 = arith.constant 0 : index
    %c0_10 = arith.constant 0 : index
    %9 = vector.load %arg6[%c0_9, %c0_10] : memref<1x32xf32, #tpu.memory_space<vmem>>, vector<1x32xf32>
    %cst_11 = arith.constant dense<0.000000e+00> : vector<16xf32>
    %10 = vector.multi_reduction <add>, %7, %cst_11 [1] : vector<16x32xf32> to vector<16xf32>
    %11 = vector.shape_cast %10 : vector<16xf32> to vector<16x1xf32>
    %cst_12 = arith.constant 3.200000e+01 : f32
    %12 = vector.broadcast %cst_12 : f32 to vector<16x1xf32>
    %13 = arith.divf %11, %12 : vector<16x1xf32>
    %14 = vector.broadcast %13 : vector<16x1xf32> to vector<16x32xf32>
    %15 = arith.subf %7, %14 : vector<16x32xf32>
    %16 = arith.mulf %15, %15 : vector<16x32xf32>
    %cst_13 = arith.constant dense<0.000000e+00> : vector<16xf32>
    %17 = vector.multi_reduction <add>, %16, %cst_13 [1] : vector<16x32xf32> to vector<16xf32>
    %18 = vector.shape_cast %17 : vector<16xf32> to vector<16x1xf32>
    %cst_14 = arith.constant 3.200000e+01 : f32
    %19 = vector.broadcast %cst_14 : f32 to vector<16x1xf32>
    %20 = arith.divf %18, %19 : vector<16x1xf32>
    %21 = vector.broadcast %13 : vector<16x1xf32> to vector<16x32xf32>
    %22 = arith.subf %7, %21 : vector<16x32xf32>
    %cst_15 = arith.constant 9.99999974E-6 : f32
    %23 = vector.broadcast %cst_15 : f32 to vector<16x1xf32>
    %24 = arith.addf %20, %23 : vector<16x1xf32>
    %25 = math.rsqrt %24 : vector<16x1xf32>
    %26 = vector.broadcast %25 : vector<16x1xf32> to vector<16x32xf32>
    %27 = arith.mulf %22, %26 : vector<16x32xf32>
    %28 = vector.broadcast %8 : vector<1x32xf32> to vector<16x32xf32>
    %29 = arith.mulf %27, %28 : vector<16x32xf32>
    %30 = vector.broadcast %9 : vector<1x32xf32> to vector<16x32xf32>
    %31 = arith.addf %29, %30 : vector<16x32xf32>
    %32 = arith.truncf %31 : vector<16x32xf32> to vector<16x32xbf16>
    %c0_16 = arith.constant 0 : index
    %c0_17 = arith.constant 0 : index
    %33 = vector.load %arg7[%c0_16, %c0_17] : memref<32x64xbf16, #tpu.memory_space<vmem>>, vector<32x64xbf16>
    %cst_18 = arith.constant dense<0.000000e+00> : vector<16x64xf32>
    %34 = tpu.matmul %32, %33, %cst_18 {dimension_numbers = #tpu.dot_dimension_numbers<[1], [0], [0], [1], [0, 0, 1, 1], [], []>} : vector<16x32xbf16>, vector<32x64xbf16>, vector<16x64xf32> -> vector<16x64xf32>
    %c0_19 = arith.constant 0 : index
    %c0_20 = arith.constant 0 : index
    %35 = vector.load %arg8[%c0_19, %c0_20] : memref<1x64xf32, #tpu.memory_space<vmem>>, vector<1x64xf32>
    %36 = vector.broadcast %35 : vector<1x64xf32> to vector<16x64xf32>
    %37 = arith.addf %34, %36 : vector<16x64xf32>
    %cst_21 = arith.constant 0.000000e+00 : f32
    %38 = vector.broadcast %cst_21 : f32 to vector<16x64xf32>
    %39 = arith.maximumf %37, %38 : vector<16x64xf32>
    %40 = arith.truncf %39 : vector<16x64xf32> to vector<16x64xbf16>
    %c0_22 = arith.constant 0 : index
    %c0_23 = arith.constant 0 : index
    %41 = vector.load %arg9[%c0_22, %c0_23] : memref<64x32xbf16, #tpu.memory_space<vmem>>, vector<64x32xbf16>
    %cst_24 = arith.constant dense<0.000000e+00> : vector<16x32xf32>
    %42 = tpu.matmul %40, %41, %cst_24 {dimension_numbers = #tpu.dot_dimension_numbers<[1], [0], [0], [1], [0, 0, 1, 1], [], []>} : vector<16x64xbf16>, vector<64x32xbf16>, vector<16x32xf32> -> vector<16x32xf32>
    %c0_25 = arith.constant 0 : index
    %c0_26 = arith.constant 0 : index
    %43 = vector.load %arg10[%c0_25, %c0_26] : memref<1x32xf32, #tpu.memory_space<vmem>>, vector<1x32xf32>
    %44 = vector.broadcast %43 : vector<1x32xf32> to vector<16x32xf32>
    %45 = arith.addf %42, %44 : vector<16x32xf32>
    %46 = arith.addf %45, %31 : vector<16x32xf32>
    %c0_27 = arith.constant 0 : index
    %c0_28 = arith.constant 0 : index
    %47 = vector.load %arg11[%c0_27, %c0_28] : memref<1x32xf32, #tpu.memory_space<vmem>>, vector<1x32xf32>
    %c0_29 = arith.constant 0 : index
    %c0_30 = arith.constant 0 : index
    %48 = vector.load %arg12[%c0_29, %c0_30] : memref<1x32xf32, #tpu.memory_space<vmem>>, vector<1x32xf32>
    %cst_31 = arith.constant dense<0.000000e+00> : vector<16xf32>
    %49 = vector.multi_reduction <add>, %46, %cst_31 [1] : vector<16x32xf32> to vector<16xf32>
    %50 = vector.shape_cast %49 : vector<16xf32> to vector<16x1xf32>
    %cst_32 = arith.constant 3.200000e+01 : f32
    %51 = vector.broadcast %cst_32 : f32 to vector<16x1xf32>
    %52 = arith.divf %50, %51 : vector<16x1xf32>
    %53 = vector.broadcast %52 : vector<16x1xf32> to vector<16x32xf32>
    %54 = arith.subf %46, %53 : vector<16x32xf32>
    %55 = arith.mulf %54, %54 : vector<16x32xf32>
    %cst_33 = arith.constant dense<0.000000e+00> : vector<16xf32>
    %56 = vector.multi_reduction <add>, %55, %cst_33 [1] : vector<16x32xf32> to vector<16xf32>
    %57 = vector.shape_cast %56 : vector<16xf32> to vector<16x1xf32>
    %cst_34 = arith.constant 3.200000e+01 : f32
    %58 = vector.broadcast %cst_34 : f32 to vector<16x1xf32>
    %59 = arith.divf %57, %58 : vector<16x1xf32>
    %60 = vector.broadcast %52 : vector<16x1xf32> to vector<16x32xf32>
    %61 = arith.subf %46, %60 : vector<16x32xf32>
    %cst_35 = arith.constant 9.99999974E-6 : f32
    %62 = vector.broadcast %cst_35 : f32 to vector<16x1xf32>
    %63 = arith.addf %59, %62 : vector<16x1xf32>
    %64 = math.rsqrt %63 : vector<16x1xf32>
    %65 = vector.broadcast %64 : vector<16x1xf32> to vector<16x32xf32>
    %66 = arith.mulf %61, %65 : vector<16x32xf32>
    %67 = vector.broadcast %47 : vector<1x32xf32> to vector<16x32xf32>
    %68 = arith.mulf %66, %67 : vector<16x32xf32>
    %69 = vector.broadcast %48 : vector<1x32xf32> to vector<16x32xf32>
    %70 = arith.addf %68, %69 : vector<16x32xf32>
    %c0_36 = arith.constant 0 : index
    %c0_37 = arith.constant 0 : index
    %71 = vector.load %arg13[%c0_36, %c0_37] : memref<16x32xf32, #tpu.memory_space<vmem>>, vector<16x32xf32>
    tpu.vector_store %arg13[%c0_36, %c0_37], %70 {strides = array<i32>} : memref<16x32xf32, #tpu.memory_space<vmem>>, vector<16x32xf32>,
    return
  }
  func.func @transform_0(%arg0: i32) -> (i32, i32) {
    %c0_i32 = arith.constant 0 : i32
    %c0_i32_0 = arith.constant 0 : i32
    return %arg0, %c0_i32 : i32, i32
  }
  func.func @transform_1(%arg0: i32) -> (i32, i32) {
    %c0_i32 = arith.constant 0 : i32
    %c0_i32_0 = arith.constant 0 : i32
    return %arg0, %c0_i32 : i32, i32
  }
  func.func @transform_2(%arg0: i32) -> (i32, i32) {
    %c0_i32 = arith.constant 0 : i32
    %c0_i32_0 = arith.constant 0 : i32
    %c0_i32_1 = arith.constant 0 : i32
    return %c0_i32, %c0_i32_0 : i32, i32
  }
  func.func @transform_3(%arg0: i32) -> (i32, i32) {
    %c0_i32 = arith.constant 0 : i32
    %c0_i32_0 = arith.constant 0 : i32
    %c0_i32_1 = arith.constant 0 : i32
    return %c0_i32, %c0_i32_0 : i32, i32
  }
  func.func @transform_4(%arg0: i32) -> (i32, i32) {
    %c0_i32 = arith.constant 0 : i32
    %c0_i32_0 = arith.constant 0 : i32
    %c0_i32_1 = arith.constant 0 : i32
    return %c0_i32, %c0_i32_0 : i32, i32
  }
  func.func @transform_5(%arg0: i32) -> (i32, i32) {
    %c0_i32 = arith.constant 0 : i32
    %c0_i32_0 = arith.constant 0 : i32
    %c0_i32_1 = arith.constant 0 : i32
    return %c0_i32, %c0_i32_0 : i32, i32
  }
  func.func @transform_6(%arg0: i32) -> (i32, i32) {
    %c0_i32 = arith.constant 0 : i32
    %c0_i32_0 = arith.constant 0 : i32
    %c0_i32_1 = arith.constant 0 : i32
    return %c0_i32, %c0_i32_0 : i32, i32
  }
  func.func @transform_7(%arg0: i32) -> (i32, i32) {
    %c0_i32 = arith.constant 0 : i32
    %c0_i32_0 = arith.constant 0 : i32
    %c0_i32_1 = arith.constant 0 : i32
    return %c0_i32, %c0_i32_0 : i32, i32
  }
  func.func @transform_8(%arg0: i32) -> (i32, i32) {
    %c0_i32 = arith.constant 0 : i32
    %c0_i32_0 = arith.constant 0 : i32
    %c0_i32_1 = arith.constant 0 : i32
    return %c0_i32, %c0_i32_0 : i32, i32
  }
  func.func @transform_9(%arg0: i32) -> (i32, i32) {
    %c0_i32 = arith.constant 0 : i32
    %c0_i32_0 = arith.constant 0 : i32
    %c0_i32_1 = arith.constant 0 : i32
    return %c0_i32, %c0_i32_0 : i32, i32
  }
  func.func @transform_10(%arg0: i32) -> (i32, i32) {
    %c0_i32 = arith.constant 0 : i32
    %c0_i32_0 = arith.constant 0 : i32
    %c0_i32_1 = arith.constant 0 : i32
    return %c0_i32, %c0_i32_0 : i32, i32
  }
  func.func @transform_11(%arg0: i32) -> (i32, i32) {
    %c0_i32 = arith.constant 0 : i32
    %c0_i32_0 = arith.constant 0 : i32
    %c0_i32_1 = arith.constant 0 : i32
    return %c0_i32, %c0_i32_0 : i32, i32
  }
  func.func @transform_12(%arg0: i32) -> (i32, i32) {
    %c0_i32 = arith.constant 0 : i32
    %c0_i32_0 = arith.constant 0 : i32
    return %arg0, %c0_i32 : i32, i32
  }
}

</mosaic_0001>

<bundles_post_ra>
// kernel: gpt_block_forward.3
= control target key start
LH: loop header
LB: loop body
LE: loop exit
PB: predicated region body
PF: predicated region fallthrough
CT: control target
= control target key end

     0   :  { %11 = vsyncpa [#allocation3], 0  ;;  %s402_s0 = inlined_call_operand.hbm [shape: f32[16,32], index: 0, kind: input, shape index: {}]   ;;  %s403_s1 = inlined_call_operand.hbm [shape: bf16[32,384], index: 1, kind: input, shape index: {}]   ;;  %s404_s2 = inlined_call_operand.vmem [shape: f32[1,384], index: 2, kind: input, shape index: {}]   ;;  %s405_s3 = inlined_call_operand.vmem [shape: bf16[16,128], index: 3, kind: output, shape index: {0}]   ;;  %s406_s4 = inlined_call_operand.vmem [shape: bf16[16,128], index: 4, kind: output, shape index: {1}]   ;;  %s407_s5 = inlined_call_operand.vmem [shape: bf16[16,128], index: 5, kind: output, shape index: {2}]  }
   0x1   :  { %12 = vsyncpa [#allocation5], 0  ;;  %s345_s18 = smov [#allocation2]  }
   0x2   :  { %s18_s19 = sshll.u32 %s345_s18, 4  ;;  %s19_s19 = int_to_ptr.vmem [resolvable:$true] %s18_s19 }
   0x3   :  { %s309_s20 = scalar_lea.vmem %s19_s19, 256  ;;  %p314_p1 = scmp.lt.s32.totalorder %s19_s19, %s19_s19 }
   0x4   :  { %p310_p0 = scmp.ne.s32.totalorder %s19_s19, %s309_s20  ;;  %p315_p2 = scmp.lt.s32.totalorder %s309_s20, %s309_s20 }
   0x6   :  { %p316_p3 = por %p315_p2, %p314_p1 }
   0x8   :  { %p317_p4 = pnand %p316_p3, %p310_p0 }
   0xa   :  { %320 = shalt.err (!%p317_p4)
}
   0xb   :  { %s346_s21 = smov 128   ;;  %s347_s22 = smov 8  }
   0xc   :  { %24 = dma.hbm_to_vmem [thread:$0]  %s402_s0, 256, %s19_s19, [#allocation3], %s346_s21, %s346_s21, %s347_s22  }
   0xd   :  { %s348_s25 = smov [#allocation4]  }
   0xe   :  { %s30_s26 = sshll.u32 %s348_s25, 4  ;;  %s31_s26 = int_to_ptr.vmem [resolvable:$true] %s30_s26 }
   0xf   :  { %s329_s27 = scalar_lea.vmem %s31_s26, 768  ;;  %p334_p6 = scmp.lt.s32.totalorder %s31_s26, %s31_s26 }
  0x10   :  { %p330_p5 = scmp.ne.s32.totalorder %s31_s26, %s329_s27  ;;  %p335_p7 = scmp.lt.s32.totalorder %s329_s27, %s329_s27 }
  0x12   :  { %p336_p8 = por %p335_p7, %p334_p6 }
  0x14   :  { %p337_p9 = pnand %p336_p8, %p330_p5 }
  0x16   :  { %340 = shalt.err (!%p337_p9)
}
  0x17   :  { %s349_s28 = smov 192   ;;  %s350_s29 = smov 12  }
  0x18   :  { %36 = dma.hbm_to_vmem [thread:$0]  %s403_s1, 768, %s31_s26, [#allocation5], %s349_s28, %s349_s28, %s350_s29  }
  0x19   :  { %341 = dma.done.wait [#allocation3], 256  }
  0x1a   :  { %342 = vsyncadd [#allocation3], 4294967040 }
  0x1b   :  { %343 = dma.done.wait [#allocation5], 768  }
  0x1c   :  { %344 = vsyncadd [#allocation5], 4294966528  ;;  %v351_v0 = vmov 0.0   ;;  %vm352_vm0 = vmmov 0   ;;  %v353_v1 = vmov 0   ;;  %v46_v8 = vld [vmem:[#allocation2] sm:$0xff]  ;;  %v59_v11 = vlaneseq }
  0x1d   :  { %276 = vmatprep.subr.bf16.mxu1 %v351_v0  ;;  %280 = vmatprep.mubr.msk.bf16.mxu1 %vm352_vm0, %v351_v0  ;;  %v293_v2 = vld [vmem:[#allocation4 + $0x1c] ss:$12 sps:$4 sm:$0xff]   ;;  %v295_v3 = vld [vmem:[#allocation4 + $0x20] ss:$12 sps:$4 sm:$0xff]   ;;  %v296_v4 = vld [vmem:[#allocation4 + $0x18] ss:$12 sps:$4 sm:$0xff]  }
  0x1e   :  { %142 = vmatprep.mubr.bf16.mxu0 %v353_v1  ;;  %122 = vmatprep.subr.bf16.mxu0 %v293_v2  ;;  %v297_v5 = vld [vmem:[#allocation4 + $0x4] ss:$12 sps:$4 sm:$0xff]   ;;  %v299_v6 = vld [vmem:[#allocation4 + $0x8] ss:$12 sps:$4 sm:$0xff]   ;;  %v300_v7 = vld [vmem:[#allocation4] ss:$12 sps:$4 sm:$0xff]  }
  0x1f   :  { %277 = vmatpush3.bf16.msra.mxu1 %v295_v3  ;;  %123 = vmatpush1.bf16.msra.mxu0 %v296_v4  ;;  %v47_v9 = vld [vmem:[#allocation2 + $0x8] sm:$0xff]  ;;  %vm106_vm1 = vcmask 261120   ;;  %v60_v12 = vshrl.u32 %v59_v11, 7  ;;  %v57_v14 = vld [vmem:[%s404_s2] sm:$0x7] }
  0x20   :  { %278 = vmatprep.subr.bf16.mxu1 %v351_v0  ;;  %124 = vmatprep.subr.bf16.mxu0 %v297_v5  ;;  %v48_v10 = vpack.c.bf16 %v47_v9, %v46_v8 }
  0x21   :  { %v69_v13 = vsub.s32 2, %v60_v12  ;;  %v61_v15 = vsub.s32 0, %v60_v12  ;;  %v65_v18 = vsub.s32 1, %v60_v12 }
  0x23   :  { %279 = vmatpush3.bf16.msra.mxu1 %v299_v6  ;;  %125 = vmatpush1.bf16.msra.mxu0 %v300_v7  ;;  %v70_v16 = vrot.slane %v57_v14, %v69_v13  ;;  %v62_v20 = vrot.slane %v57_v14, %v61_v15  ;;  %v66_v24 = vrot.slane %v57_v14, %v65_v18 }
  0x26   :  { %281 = vmatmul.mubr.msk.bf16.vlgmr.msra.gmra.mxu1 %vm106_vm1, %v48_v10  ;;  %244 = vmatmul.mubr.msk.bf16.vlgmr.msra.gmra.mxu0 %vm106_vm1, %v48_v10 }
  0xe6   :  { %v187_v17 = vpop.f32.mrf.mxu1  ;;  %v144_v19 = vpop.f32.mrf.mxu0 }
  0xe7   :  { %v188_v22 = vadd.f32 %v187_v17, %v70_v16  ;;  %v145_v28 = vadd.f32 %v144_v19, %v62_v20 }
  0xe8   :  { %v282_v21 = vpop.f32.mrf.mxu1  ;;  %v146_v23 = vpop.f32.mrf.mxu0 }
  0xe9   :  { %v147_v33 = vadd.f32 %v146_v23, %v66_v24 }
  0xea   :  { %v190_v25 = vpop.f32.mrf.mxu1  ;;  %v148_v27 = vpop.f32.mrf.mxu0 }
  0xeb   :  { %v191_v26 = vadd.f32 %v190_v25, %v70_v16  ;;  %v149_v29 = vadd.f32 %v148_v27, %v62_v20 }
  0xec   :  { %v283_v30 = vpop.f32.mrf.mxu1  ;;  %v150_v32 = vpop.f32.mrf.mxu0 }
  0xed   :  { %v271_v31 = vpack.c.bf16 %v191_v26, %v188_v22  ;;  %v261_v34 = vpack.c.bf16 %v149_v29, %v145_v28  ;;  %v151_v35 = vadd.f32 %v150_v32, %v66_v24 }
  0xef   :  { %272 = vst [vmem:[%s407_s5] sm:$0xff] %v271_v31   ;;  %262 = vst [vmem:[%s405_s3] sm:$0xff] %v261_v34   ;;  %v266_v36 = vpack.c.bf16 %v151_v35, %v147_v33 }
  0xf1   :  { %267 = vst [vmem:[%s406_s4] sm:$0xff] %v266_v36  }
  0xf2   :  { %236 = vsyncpa [#allocation3], 1 }
  0xf3   :  { %237 = vsyncpa [#allocation5], 1 }

// kernel: gpt_block_forward.4
= control target key start
LH: loop header
LB: loop body
LE: loop exit
PB: predicated region body
PF: predicated region fallthrough
CT: control target
= control target key end

     0   :  { %s891_s12 = smov 0   ;;  %s972_s0 = inlined_call_operand.vmem [shape: bf16[2,4,8,32], index: 0, kind: input, shape index: {}]   ;;  %s973_s1 = inlined_call_operand.vmem [shape: bf16[2,4,8,32], index: 1, kind: input, shape index: {}]   ;;  %s974_s2 = inlined_call_operand.vmem [shape: bf16[2,4,8,32], index: 2, kind: input, shape index: {}]   ;;  %s975_s3 = inlined_call_operand.vmem [shape: bf16[2,4,8,32], index: 3, kind: output, shape index: {}]  }
   0x1 LB: > { %s744_s13 = sadd.s32 4294967295, %s867_s12   ;;  %p748_p0 = scmp.ge.s32.totalorder %s867_s12, 1  ;;  %s867_s12 = sphi %s891_s12, %s13_s12  }
   0x2   : > { %p157_p1 = scmp.lt.s32.totalorder %s867_s12, 3 }
   0x4   : > { %p158_p2 = pnand %p748_p0, %p157_p1 }
   0x5   : > { %p191_p3 = scmp.lt.s32.totalorder (!%p158_p2), %s744_s13, 1 }
   0x6   : > { %161 = sbr.rel (%p158_p2) target bundleno = 744 (0x2e8), region = 32 }
   0xb   : > { %v869_v0 = vmov 0.0   ;;  %s977_s13 = smov (!%p191_p3, %s744_s13), 1  ;;  %vm870_vm0 = vmmov 0   ;;  %vm224_vm1 = vcmask 261120   ;;  %v413_v13 = vlaneseq }
   0xc   : > { %787 = vmatprep.subr.bf16.mxu0 %v869_v0  ;;  %793 = vmatprep.subr.bf16.mxu1 %v869_v0  ;;  %s905_s14 = sshll.u32 %s977_s13, 4  ;;  %vm422_vm3 = vcmask 64512   ;;  %vm474_vm4 = vcmask 1043456   ;;  %vm660_vm5 = vcmask 257024  }
   0xd   : > { %789 = vmatprep.mubr.msk.bf16.mxu0 %vm870_vm0, %v869_v0  ;;  %795 = vmatprep.mubr.msk.bf16.mxu1 %vm870_vm0, %v869_v0  ;;  %s200_s17 = scalar_lea.vmem %s973_s1, %s905_s14  ;;  %s195_s20 = scalar_lea.vmem %s972_s0, %s905_s14  ;;  %v414_v14 = vshrl.u32 %v413_v13, 7  ;;  %v416_v15 = vand.u32 127, %v413_v13 }
   0xe   : > { %v216_v1 = vld [vmem:[%s200_s17] sm:$0xf]  ;;  %v217_v2 = vld [vmem:[%s200_s17 + $0x4] sm:$0xf]  ;;  %v218_v5 = vld [vmem:[%s200_s17 + $0x8] sm:$0xf]  ;;  %s205_s23 = scalar_lea.vmem %s974_s2, %s905_s14  ;;  %s210_s26 = scalar_lea.vmem %s975_s3, %s905_s14 }
   0xf   : > { %v229_v3 = vsel %vm224_vm1, %v216_v1, 0  ;;  %v275_v4 = vsel %vm224_vm1, %v217_v2, 0  ;;  %v219_v6 = vld [vmem:[%s200_s17 + $0xc] sm:$0xf]  ;;  %v212_v7 = vld [vmem:[%s195_s20] sm:$0xf]  ;;  %vm417_vm2 = vcmp.gt.s32.totalorder %v416_v15, %v414_v14 }
  0x10   : > { %788 = vmatpush3.bf16.xpose.msra.mxu0 %v229_v3  ;;  %794 = vmatpush3.bf16.xpose.msra.mxu1 %v275_v4  ;;  %v213_v8 = vld [vmem:[%s195_s20 + $0x4] sm:$0xf]  ;;  %v321_v9 = vsel %vm224_vm1, %v218_v5, 0  ;;  %v367_v10 = vsel %vm224_vm1, %v219_v6, 0  ;;  %v214_v11 = vld [vmem:[%s195_s20 + $0x8] sm:$0xf] }
  0x11   : > { %799 = vmatprep.subr.bf16.mxu0 %v869_v0  ;;  %805 = vmatprep.subr.bf16.mxu1 %v869_v0  ;;  %v215_v12 = vld [vmem:[%s195_s20 + $0xc] sm:$0xf]  ;;  %v220_v1 = vld [vmem:[%s205_s23] sm:$0xf]  ;;  %v221_v2 = vld [vmem:[%s205_s23 + $0x4] sm:$0xf] }
  0x12   : > { %v476_v3 = vsel %vm474_vm4, %v220_v1, 0  ;;  %v522_v4 = vsel %vm474_vm4, %v221_v2, 0  ;;  %v222_v5 = vld [vmem:[%s205_s23 + $0x8] sm:$0xf] }
  0x13   : > { %v568_v6 = vsel %vm474_vm4, %v222_v5, 0 }
  0x17   : > { %790 = vmatmul.mubr.msk.bf16.vlgmr.msra.gmra.mxu0 %vm224_vm1, %v212_v7  ;;  %796 = vmatmul.mubr.msk.bf16.vlgmr.msra.gmra.mxu1 %vm224_vm1, %v213_v8  ;;  %v223_v7 = vld [vmem:[%s205_s23 + $0xc] sm:$0xf] }
  0x18   : > { %800 = vmatpush3.bf16.xpose.msra.mxu0 %v321_v9  ;;  %806 = vmatpush3.bf16.xpose.msra.mxu1 %v367_v10  ;;  %v614_v8 = vsel %vm474_vm4, %v223_v7, 0 }
  0x19   : > { %801 = vmatprep.mubr.msk.bf16.mxu0 %vm870_vm0, %v869_v0  ;;  %807 = vmatprep.mubr.msk.bf16.mxu1 %vm870_vm0, %v869_v0 }
  0x1a   : > { %811 = vmatprep.subr.bf16.mxu0 %v869_v0  ;;  %817 = vmatprep.subr.bf16.mxu1 %v869_v0 }
  0x1f   : > { %802 = vmatmul.mubr.msk.bf16.vlgmr.msra.gmra.mxu0 %vm224_vm1, %v214_v11  ;;  %808 = vmatmul.mubr.msk.bf16.vlgmr.msra.gmra.mxu1 %vm224_vm1, %v215_v12 }
  0x20   : > { %813 = vmatprep.mubr.msk.bf16.mxu0 %vm870_vm0, %v869_v0  ;;  %819 = vmatprep.mubr.msk.bf16.mxu1 %vm870_vm0, %v869_v0 }
  0x21   : > { %812 = vmatpush3.bf16.msra.mxu0 %v476_v3  ;;  %818 = vmatpush3.bf16.msra.mxu1 %v522_v4 }
  0x22   : > { %823 = vmatprep.subr.bf16.mxu0 %v869_v0  ;;  %829 = vmatprep.subr.bf16.mxu1 %v869_v0 }
  0xd7   : > { %v265_v16 = vpop.f32.mrf.mxu0  ;;  %v311_v17 = vpop.f32.mrf.mxu1 }
  0xd8   : > { %v409_v18 = vmul.f32 0.17677669, %v265_v16  ;;  %v410_v19 = vmul.f32 0.17677669, %v311_v17 }
  0xd9   : > { %v791_v20 = vpop.f32.mrf.mxu0  ;;  %v797_v21 = vpop.f32.mrf.mxu1 }
  0xda   : > { %v418_v22 = vsel %vm417_vm2, -inf, %v409_v18  ;;  %v419_v23 = vsel %vm417_vm2, -inf, %v410_v19 }
  0xdb   : > { %v268_v24 = vpop.f32.mrf.mxu0  ;;  %v314_v25 = vpop.f32.mrf.mxu1  ;;  %v423_v26 = vsel %vm422_vm3, %v418_v22, -inf  ;;  %v426_v29 = vsel %vm422_vm3, %v419_v23, -inf }
  0xdc   : > { %424 = vmax.xlane.f32.xlu0 %v423_v26 }
  0xdd   : > { %v792_v27 = vpop.f32.mrf.mxu0  ;;  %v798_v28 = vpop.f32.mrf.mxu1 }
  0xdf   : > { %v357_v30 = vpop.f32.mrf.mxu0  ;;  %v403_v31 = vpop.f32.mrf.mxu1 }
  0xe0   : > { %v411_v32 = vmul.f32 0.17677669, %v357_v30  ;;  %v412_v33 = vmul.f32 0.17677669, %v403_v31  ;;  %427 = vmax.xlane.f32.xlu0 %v426_v29 }
  0xe1   : > { %v803_v34 = vpop.f32.mrf.mxu0  ;;  %v809_v35 = vpop.f32.mrf.mxu1 }
  0xe2   : > { %v420_v36 = vsel %vm417_vm2, -inf, %v411_v32  ;;  %v421_v37 = vsel %vm417_vm2, -inf, %v412_v33 }
  0xe3   : > { %v360_v38 = vpop.f32.mrf.mxu0  ;;  %v406_v39 = vpop.f32.mrf.mxu1  ;;  %v429_v40 = vsel %vm422_vm3, %v420_v36, -inf  ;;  %v432_v43 = vsel %vm422_vm3, %v421_v37, -inf }
  0xe4   : > { %430 = vmax.xlane.f32.xlu1 %v429_v40 }
  0xe5   : > { %v804_v41 = vpop.f32.mrf.mxu0  ;;  %v810_v42 = vpop.f32.mrf.mxu1 }
  0xe8   : > { %433 = vmax.xlane.f32.xlu1 %v432_v43 }
 0x165   : > { %v425_v44 = vpop.xlane.xlu0 %424 }
 0x166   : > { %v435_v45 = vsub.f32 %v418_v22, %v425_v44 }
 0x168   : > { %v439_v46 = vmul.f32 1.442695, %v435_v45 }
 0x169   : > { %v428_v47 = vpop.xlane.xlu0 %427 }
 0x16a   : > { %845 = vpow2.f32 %v439_v46  ;;  %v436_v48 = vsub.f32 %v419_v23, %v428_v47 }
 0x16c   : > { %v441_v49 = vmul.f32 1.442695, %v436_v48 }
 0x16d   : > { %v431_v50 = vpop.xlane.xlu1 %430 }
 0x16e   : > { %847 = vpow2.f32 %v441_v49  ;;  %v437_v51 = vsub.f32 %v420_v36, %v431_v50 }
 0x170   : > { %v443_v52 = vmul.f32 1.442695, %v437_v51 }
 0x171   : > { %v434_v53 = vpop.xlane.xlu1 %433 }
 0x172   : > { %849 = vpow2.f32 %v443_v52  ;;  %v438_v54 = vsub.f32 %v421_v37, %v434_v53 }
 0x174   : > { %v445_v55 = vmul.f32 1.442695, %v438_v54 }
 0x176   : > { %851 = vpow2.f32 %v445_v55 }
 0x177   : > { %v846_v56 = vpop.eup %845 }
 0x178   : > { %v447_v57 = vsel %vm422_vm3, %v846_v56, 0.0 }
 0x179   : > { %448 = vadd.xlane.f32.xlu0 %v447_v57 }
 0x17b   : > { %v848_v58 = vpop.eup %847 }
 0x17c   : > { %v450_v59 = vsel %vm422_vm3, %v848_v58, 0.0 }
 0x17d   : > { %451 = vadd.xlane.f32.xlu1 %v450_v59 }
 0x17f   : > { %v850_v60 = vpop.eup %849 }
 0x180   : > { %v453_v61 = vsel %vm422_vm3, %v850_v60, 0.0 }
 0x181   : > { %454 = vadd.xlane.f32.xlu0 %v453_v61 }
 0x183   : > { %v852_v62 = vpop.eup %851 }
 0x184   : > { %v456_v63 = vsel %vm422_vm3, %v852_v62, 0.0 }
 0x185   : > { %457 = vadd.xlane.f32.xlu1 %v456_v63 }
 0x202   : > { %v449_v9 = vpop.xlane.xlu0 %448 }
 0x203   : > { %853 = vrcp.f32 %v449_v9 }
 0x206   : > { %v452_v10 = vpop.xlane.xlu1 %451 }
 0x207   : > { %855 = vrcp.f32 %v452_v10 }
 0x20a   : > { %v455_v11 = vpop.xlane.xlu0 %454 }
 0x20b   : > { %857 = vrcp.f32 %v455_v11 }
 0x20e   : > { %v458_v12 = vpop.xlane.xlu1 %457 }
 0x20f   : > { %859 = vrcp.f32 %v458_v12 }
 0x210   : > { %v854_v13 = vpop.eup %853 }
 0x211   : > { %v463_v14 = vmul.f32 %v854_v13, %v846_v56 }
 0x213   : > { %v467_v15 = vpack.c.bf16 %v463_v14, %v463_v14 }
 0x214   : > { %v856_v16 = vpop.eup %855 }
 0x215   : > { %814 = vmatmul.mubr.msk.bf16.vlgmr.msra.gmra.mxu0 %vm422_vm3, %v467_v15  ;;  %v464_v17 = vmul.f32 %v856_v16, %v848_v58 }
 0x216   : > { %824 = vmatpush3.bf16.msra.mxu0 %v568_v6  ;;  %825 = vmatprep.mubr.msk.bf16.mxu0 %vm870_vm0, %v869_v0 }
 0x217   : > { %v468_v18 = vpack.c.bf16 %v464_v17, %v464_v17 }
 0x218   : > { %v858_v19 = vpop.eup %857 }
 0x219   : > { %820 = vmatmul.mubr.msk.bf16.vlgmr.msra.gmra.mxu1 %vm422_vm3, %v468_v18  ;;  %v465_v20 = vmul.f32 %v858_v19, %v850_v60 }
 0x21a   : > { %830 = vmatpush3.bf16.msra.mxu1 %v614_v8  ;;  %831 = vmatprep.mubr.msk.bf16.mxu1 %vm870_vm0, %v869_v0 }
 0x21b   : > { %v469_v21 = vpack.c.bf16 %v465_v20, %v465_v20 }
 0x21c   : > { %v860_v22 = vpop.eup %859 }
 0x21d   : > { %826 = vmatmul.mubr.msk.bf16.vlgmr.msra.gmra.mxu0 %vm422_vm3, %v469_v21  ;;  %v466_v23 = vmul.f32 %v860_v22, %v852_v62 }
 0x21f   : > { %v470_v24 = vpack.c.bf16 %v466_v23, %v466_v23 }
 0x221   : > { %832 = vmatmul.mubr.msk.bf16.vlgmr.msra.gmra.mxu1 %vm422_vm3, %v470_v24 }
 0x2d5   : > { %v512_v25 = vpop.f32.mrf.mxu0 }
 0x2d6   : > { %v656_v26 = vpack.c.bf16 %v512_v25, %v512_v25 }
 0x2d7   : > { %v815_v27 = vpop.f32.mrf.mxu0 }
 0x2d8   : > { %661 = vst.msk [vmem:[%s210_s26] sm:$0xf] %vm660_vm5, %v656_v26 }
 0x2d9   : > { %v515_v28 = vpop.f32.mrf.mxu0  ;;  %v558_v0 = vpop.f32.mrf.mxu1 }
 0x2da   : > { %v657_v29 = vpack.c.bf16 %v558_v0, %v558_v0 }
 0x2db   : > { %v816_v30 = vpop.f32.mrf.mxu0  ;;  %v821_v31 = vpop.f32.mrf.mxu1 }
 0x2dc   : > { %662 = vst.msk [vmem:[%s210_s26 + $0x4] sm:$0xf] %vm660_vm5, %v657_v29 }
 0x2dd   : > { %v561_v32 = vpop.f32.mrf.mxu1  ;;  %v604_v33 = vpop.f32.mrf.mxu0 }
 0x2de   : > { %v658_v34 = vpack.c.bf16 %v604_v33, %v604_v33 }
 0x2df   : > { %v822_v35 = vpop.f32.mrf.mxu1  ;;  %v827_v36 = vpop.f32.mrf.mxu0 }
 0x2e0   : > { %663 = vst.msk [vmem:[%s210_s26 + $0x8] sm:$0xf] %vm660_vm5, %v658_v34 }
 0x2e1   : > { %v607_v37 = vpop.f32.mrf.mxu0  ;;  %v650_v38 = vpop.f32.mrf.mxu1 }
 0x2e2   : > { %v659_v39 = vpack.c.bf16 %v650_v38, %v650_v38 }
 0x2e3   : > { %v828_v40 = vpop.f32.mrf.mxu0  ;;  %v833_v41 = vpop.f32.mrf.mxu1 }
 0x2e4   : > { %664 = vst.msk [vmem:[%s210_s26 + $0xc] sm:$0xf] %vm660_vm5, %v659_v39 }
 0x2e5   : > { %v653_v42 = vpop.f32.mrf.mxu1 }
 0x2e7   : > { %v834_v43 = vpop.f32.mrf.mxu1 }
 0x2e8 PF: > { %s13_s12 = sadd.s32 1, %s867_s12  }
 0x2e9   : > { %p10_p4 = scmp.ge.s32.totalorder %s13_s12, 4  }
 0x2eb   :  { %12 = sbr.rel (!%p10_p4) target bundleno = 1 (0x1), region = 68 }

// kernel: gpt_block_forward.5
= control target key start
LH: loop header
LB: loop body
LE: loop exit
PB: predicated region body
PF: predicated region fallthrough
CT: control target
= control target key end

     0   :  { %v563_v1 = vmov 0.0   ;;  %vm564_vm0 = vmmov 0   ;;  %s739_s0 = inlined_call_operand.vmem [shape: bf16[16,128], index: 0, kind: input, shape index: {}]   ;;  %s740_s1 = inlined_call_operand.vmem [shape: f32[16,32], index: 1, kind: input, shape index: {}]   ;;  %s741_s2 = inlined_call_operand.vmem [shape: bf16[128,32], index: 2, kind: input, shape index: {}]   ;;  %s742_s3 = inlined_call_operand.vmem [shape: f32[1,32], index: 3, kind: input, shape index: {}]   ;;  %s743_s4 = inlined_call_operand.vmem [shape: f32[1,32], index: 4, kind: input, shape index: {}]   ;;  %s744_s5 = inlined_call_operand.vmem [shape: f32[1,32], index: 5, kind: input, shape index: {}]   ;;  %s745_s6 = inlined_call_operand.vmem [shape: bf16[32,64], index: 6, kind: input, shape index: {}]   ;;  %s746_s7 = inlined_call_operand.vmem [shape: f32[1,64], index: 7, kind: input, shape index: {}]   ;;  %s747_s8 = inlined_call_operand.vmem [shape: bf16[64,32], index: 8, kind: input, shape index: {}]   ;;  %s748_s9 = inlined_call_operand.vmem [shape: f32[1,32], index: 9, kind: input, shape index: {}]   ;;  %s749_s10 = inlined_call_operand.vmem [shape: f32[1,32], index: 10, kind: input, shape index: {}]   ;;  %s750_s11 = inlined_call_operand.vmem [shape: f32[1,32], index: 11, kind: input, shape index: {}]   ;;  %s751_s12 = inlined_call_operand.hbm [shape: f32[16,32], index: 12, kind: output, shape index: {}]  }
   0x1   :  { %v518_v0 = vld [vmem:[%s741_s2 + $0x38] sm:$0xff]   ;;  %473 = vmatprep.subr.bf16.mxu0 %v563_v1  ;;  %493 = vmatprep.subr.bf16.mxu1 %v563_v1  ;;  %v519_v2 = vld [vmem:[%s741_s2 + $0x30] sm:$0xff]   ;;  %v520_v3 = vld [vmem:[%s741_s2 + $0x28] sm:$0xff]  }
   0x2   :  { %474 = vmatpush3.bf16.msra.mxu0 %v518_v0  ;;  %489 = vmatprep.mubr.msk.bf16.mxu0 %vm564_vm0, %v563_v1  ;;  %v521_v4 = vld [vmem:[%s741_s2 + $0x20] sm:$0xff]  }
   0x3   :  { %475 = vmatprep.subr.bf16.mxu0 %v563_v1  ;;  %497 = vmatprep.mubr.msk.bf16.mxu1 %vm564_vm0, %v563_v1 }
   0x6   :  { %476 = vmatpush3.bf16.msra.mxu0 %v519_v2 }
   0x7   :  { %477 = vmatprep.subr.bf16.mxu0 %v563_v1 }
   0xa   :  { %478 = vmatpush3.bf16.msra.mxu0 %v520_v3 }
   0xb   :  { %479 = vmatprep.subr.bf16.mxu0 %v563_v1 }
   0xc   :  { %17 = vsyncpa [#allocation3], 0  ;;  %v522_v5 = vld [vmem:[%s741_s2 + $0x18] sm:$0xff]   ;;  %v523_v6 = vld [vmem:[%s741_s2 + $0x10] sm:$0xff]   ;;  %vm169_vm1 = vcmask 261120   ;;  %vm323_vm2 = vcmask 523264  }
   0xd   :  { %v524_v7 = vld [vmem:[%s741_s2 + $0x8] sm:$0xff]   ;;  %v525_v8 = vld [vmem:[%s741_s2] sm:$0xff]   ;;  %v529_v51 = vld [vmem:[%s747_s8 + $0x18] sm:$0xff]   ;;  %s565_s23 = smov [#allocation2]  }
   0xe   :  { %480 = vmatpush3.bf16.msra.mxu0 %v521_v4  ;;  %v526_v9 = vld [vmem:[%s739_s0] sm:$0xff]   ;;  %v44_v17 = vld [vmem:[%s740_s1 + $0x8] sm:$0xff]  ;;  %v530_v53 = vld [vmem:[%s747_s8 + $0x10] sm:$0xff]   ;;  %s421_s24 = sshll.u32 %s565_s23, 4  ;;  %s422_s24 = int_to_ptr.vmem [resolvable:$true] %s421_s24 }
   0xf   :  { %481 = vmatprep.subr.bf16.mxu0 %v563_v1  ;;  %v432_v10 = vld [vmem:[%s742_s3] ss:$0 sm:$0xff]  ;;  %v527_v33 = vld [vmem:[%s745_s6 + $0x8] sm:$0xff]   ;;  %s541_s2 = scalar_lea.vmem %s422_s24, 256  ;;  %p546_p1 = scmp.lt.s32.totalorder %s422_s24, %s422_s24 }
  0x10   :  { %v43_v12 = vld [vmem:[%s740_s1] sm:$0xff]  ;;  %494 = vmatpush3.bf16.msra.mxu1 %v527_v33  ;;  %v531_v54 = vld [vmem:[%s747_s8 + $0x8] sm:$0xff]   ;;  %p542_p0 = scmp.ne.s32.totalorder %s422_s24, %s541_s2  ;;  %p547_p2 = scmp.lt.s32.totalorder %s541_s2, %s541_s2 }
  0x11   :  { %v528_v34 = vld [vmem:[%s745_s6] sm:$0xff]   ;;  %495 = vmatprep.subr.bf16.mxu1 %v563_v1 }
  0x12   :  { %482 = vmatpush3.bf16.msra.mxu0 %v522_v5  ;;  %v442_v43 = vld [vmem:[%s743_s4] ss:$0 sm:$0xff]  ;;  %p548_p3 = por %p547_p2, %p546_p1 }
  0x13   :  { %483 = vmatprep.subr.bf16.mxu0 %v563_v1  ;;  %v443_v47 = vld [vmem:[%s744_s5] ss:$0 sm:$0xff] }
  0x14   :  { %496 = vmatpush3.bf16.msra.mxu1 %v528_v34  ;;  %v532_v55 = vld [vmem:[%s747_s8] sm:$0xff]   ;;  %p549_p4 = pnand %p548_p3, %p542_p0 }
  0x15   :  { %501 = vmatprep.subr.bf16.mxu1 %v563_v1  ;;  %v444_v56 = vld [vmem:[%s746_s7] ss:$0 sm:$0xff] }
  0x16   :  { %484 = vmatpush3.bf16.msra.mxu0 %v523_v6 }
  0x17   :  { %485 = vmatprep.subr.bf16.mxu0 %v563_v1 }
  0x1a   :  { %486 = vmatpush3.bf16.msra.mxu0 %v524_v7 }
  0x1b   :  { %487 = vmatprep.subr.bf16.mxu0 %v563_v1 }
  0x1e   :  { %488 = vmatpush3.bf16.msra.mxu0 %v525_v8 }
  0x21   :  { %490 = vmatmul.mubr.bf16.vlgmr.msra.gmra.mxu0 %v526_v9 }
  0xe1   :  { %v158_v11 = vpop.f32.mrf.mxu0 }
  0xe2   :  { %v159_v13 = vadd.f32 %v432_v10, %v158_v11 }
  0xe3   :  { %v491_v14 = vpop.f32.mrf.mxu0 }
  0xe4   :  { %v165_v15 = vadd.f32 %v159_v13, %v43_v12 }
  0xe5   :  { %v161_v16 = vpop.f32.mrf.mxu0 }
  0xe6   :  { %v162_v18 = vadd.f32 %v432_v10, %v161_v16  ;;  %v170_v19 = vsel %vm169_vm1, %v165_v15, 0.0 }
  0xe7   :  { %v492_v20 = vpop.f32.mrf.mxu0  ;;  %171 = vadd.xlane.f32.xlu0 %v170_v19 }
  0xe8   :  { %v166_v21 = vadd.f32 %v162_v18, %v44_v17 }
  0xea   :  { %v173_v22 = vsel %vm169_vm1, %v166_v21, 0.0 }
  0xeb   :  { %174 = vadd.xlane.f32.xlu0 %v173_v22 }
 0x170   :  { %v172_v23 = vpop.xlane.xlu0 %171 }
 0x171   :  { %v177_v24 = vmul.f32 0.03125, %v172_v23 }
 0x173   :  { %v179_v25 = vsub.f32 %v165_v15, %v177_v24 }
 0x174   :  { %v175_v26 = vpop.xlane.xlu0 %174 }
 0x175   :  { %v178_v27 = vmul.f32 0.03125, %v175_v26  ;;  %v181_v28 = vmul.f32 %v179_v25, %v179_v25 }
 0x177   :  { %v180_v29 = vsub.f32 %v166_v21, %v178_v27  ;;  %v183_v30 = vsel %vm169_vm1, %v181_v28, 0.0 }
 0x178   :  { %184 = vadd.xlane.f32.xlu1 %v183_v30  ;;  %v454_v30 = vld [vmem:[%s749_s10] ss:$0 sm:$0xff] }
 0x179   :  { %v182_v31 = vmul.f32 %v180_v29, %v180_v29 }
 0x17b   :  { %v186_v32 = vsel %vm169_vm1, %v182_v31, 0.0 }
 0x17c   :  { %187 = vadd.xlane.f32.xlu1 %v186_v32  ;;  %v455_v32 = vld [vmem:[%s750_s11] ss:$0 sm:$0xff] }
 0x201   :  { %v185_v35 = vpop.xlane.xlu1 %184 }
 0x202   :  { %v189_v36 = vmul.f32 0.03125, %v185_v35 }
 0x204   :  { %v191_v37 = vadd.f32 1e-05, %v189_v36 }
 0x205   :  { %v188_v38 = vpop.xlane.xlu1 %187 }
 0x206   :  { %533 = vrsqrt.f32 %v191_v37  ;;  %v190_v39 = vmul.f32 0.03125, %v188_v38 }
 0x208   :  { %v192_v40 = vadd.f32 1e-05, %v190_v39 }
 0x20a   :  { %535 = vrsqrt.f32 %v192_v40 }
 0x213   :  { %v534_v41 = vpop.eup %533 }
 0x214   :  { %v195_v42 = vmul.f32 %v534_v41, %v179_v25 }
 0x216   :  { %v203_v46 = vmul.f32 %v442_v43, %v195_v42 }
 0x217   :  { %v536_v44 = vpop.eup %535 }
 0x218   :  { %v196_v45 = vmul.f32 %v536_v44, %v180_v29  ;;  %v211_v49 = vadd.f32 %v443_v47, %v203_v46 }
 0x21a   :  { %v204_v48 = vmul.f32 %v442_v43, %v196_v45 }
 0x21c   :  { %v212_v50 = vadd.f32 %v443_v47, %v204_v48 }
 0x21e   :  { %v213_v52 = vpack.c.bf16 %v212_v50, %v211_v49 }
 0x220   :  { %498 = vmatmul.mubr.msk.bf16.vlgmr.msra.gmra.mxu1 %vm169_vm1, %v213_v52 }
 0x221   :  { %502 = vmatpush3.bf16.msra.mxu1 %v529_v51  ;;  %509 = vmatprep.mubr.msk.bf16.mxu1 %vm564_vm0, %v563_v1 }
 0x222   :  { %503 = vmatprep.subr.bf16.mxu1 %v563_v1 }
 0x225   :  { %504 = vmatpush3.bf16.msra.mxu1 %v530_v53 }
 0x226   :  { %505 = vmatprep.subr.bf16.mxu1 %v563_v1 }
 0x229   :  { %506 = vmatpush3.bf16.msra.mxu1 %v531_v54 }
 0x22a   :  { %507 = vmatprep.subr.bf16.mxu1 %v563_v1  ;;  %v448_v1 = vld [vmem:[%s748_s9] ss:$0 sm:$0xff] }
 0x22d   :  { %508 = vmatpush3.bf16.msra.mxu1 %v532_v55 }
 0x2e0   :  { %v274_v57 = vpop.f32.mrf.mxu1 }
 0x2e1   :  { %v275_v59 = vadd.f32 %v444_v56, %v274_v57 }
 0x2e2   :  { %v499_v58 = vpop.f32.mrf.mxu1 }
 0x2e3   :  { %v281_v63 = vmax.f32 %v275_v59, 0.0 }
 0x2e4   :  { %v277_v60 = vpop.f32.mrf.mxu1 }
 0x2e5   :  { %v278_v61 = vadd.f32 %v444_v56, %v277_v60 }
 0x2e6   :  { %v500_v62 = vpop.f32.mrf.mxu1 }
 0x2e7   :  { %v282_v0 = vmax.f32 %v278_v61, 0.0 }
 0x2e9   :  { %v283_v2 = vpack.c.bf16 %v282_v0, %v281_v63 }
 0x2eb   :  { %510 = vmatmul.mubr.msk.bf16.vlgmr.msra.gmra.mxu1 %vm323_vm2, %v283_v2 }
 0x3ab   :  { %v361_v3 = vpop.f32.mrf.mxu1 }
 0x3ac   :  { %v362_v4 = vadd.f32 %v448_v1, %v361_v3 }
 0x3ad   :  { %v511_v5 = vpop.f32.mrf.mxu1 }
 0x3ae   :  { %v368_v6 = vadd.f32 %v362_v4, %v211_v49 }
 0x3af   :  { %v364_v7 = vpop.f32.mrf.mxu1 }
 0x3b0   :  { %v365_v8 = vadd.f32 %v448_v1, %v364_v7  ;;  %v372_v9 = vsel %vm169_vm1, %v368_v6, 0.0 }
 0x3b1   :  { %373 = vadd.xlane.f32.xlu0 %v372_v9  ;;  %v512_v10 = vpop.f32.mrf.mxu1 }
 0x3b2   :  { %v369_v11 = vadd.f32 %v365_v8, %v212_v50 }
 0x3b4   :  { %v375_v12 = vsel %vm169_vm1, %v369_v11, 0.0 }
 0x3b5   :  { %376 = vadd.xlane.f32.xlu1 %v375_v12 }
 0x43a   :  { %v374_v13 = vpop.xlane.xlu0 %373 }
 0x43b   :  { %v378_v14 = vmul.f32 0.03125, %v374_v13 }
 0x43d   :  { %v380_v15 = vsub.f32 %v368_v6, %v378_v14 }
 0x43e   :  { %v377_v16 = vpop.xlane.xlu1 %376 }
 0x43f   :  { %v379_v17 = vmul.f32 0.03125, %v377_v16  ;;  %v382_v18 = vmul.f32 %v380_v15, %v380_v15 }
 0x441   :  { %v381_v19 = vsub.f32 %v369_v11, %v379_v17  ;;  %v384_v20 = vsel %vm169_vm1, %v382_v18, 0.0 }
 0x442   :  { %385 = vadd.xlane.f32.xlu0 %v384_v20 }
 0x443   :  { %v383_v21 = vmul.f32 %v381_v19, %v381_v19 }
 0x445   :  { %v387_v22 = vsel %vm169_vm1, %v383_v21, 0.0 }
 0x446   :  { %388 = vadd.xlane.f32.xlu1 %v387_v22 }
 0x4cb   :  { %v386_v23 = vpop.xlane.xlu0 %385 }
 0x4cc   :  { %v390_v24 = vmul.f32 0.03125, %v386_v23 }
 0x4ce   :  { %v392_v25 = vadd.f32 1e-05, %v390_v24 }
 0x4cf   :  { %v389_v26 = vpop.xlane.xlu1 %388 }
 0x4d0   :  { %537 = vrsqrt.f32 %v392_v25  ;;  %v391_v27 = vmul.f32 0.03125, %v389_v26 }
 0x4d2   :  { %v393_v28 = vadd.f32 1e-05, %v391_v27 }
 0x4d4   :  { %539 = vrsqrt.f32 %v393_v28 }
 0x4dd   :  { %v538_v29 = vpop.eup %537 }
 0x4de   :  { %v396_v31 = vmul.f32 %v538_v29, %v380_v15 }
 0x4e0   :  { %v404_v33 = vmul.f32 %v454_v30, %v396_v31 }
 0x4e1   :  { %v540_v34 = vpop.eup %539 }
 0x4e2   :  { %v397_v35 = vmul.f32 %v540_v34, %v381_v19  ;;  %v412_v36 = vadd.f32 %v455_v32, %v404_v33 }
 0x4e4   :  { %v405_v37 = vmul.f32 %v454_v30, %v397_v35  ;;  %414 = vst.msk [vmem:[#allocation2] sm:$0xff] %vm169_vm1, %v412_v36 }
 0x4e6   :  { %v413_v38 = vadd.f32 %v455_v32, %v405_v37 }
 0x4e8   :  { %415 = vst.msk [vmem:[#allocation2 + $0x8] sm:$0xff] %vm169_vm1, %v413_v38 }
 0x4e9   :  { %552 = shalt.err (!%p549_p4)
}
 0x4ea   :  { %s566_s10 = smov 128   ;;  %s567_s11 = smov 8  }
 0x4eb   :  { %427 = dma.vmem_to_hbm [thread:$0]  %s422_s24, 256, %s751_s12, [#allocation3], %s566_s10, %s566_s10, %s567_s11  }
 0x4ec   :  { %561 = dma.done.wait [#allocation3], 256  }
 0x4ed   :  { %562 = vsyncadd [#allocation3], 4294967040 }
 0x4ee   :  { %431 = vsyncpa [#allocation3], 1 }

</bundles_post_ra>
